<compile_context>
chip_gen: v7x
topology: tpu7x:2x2x1
jax: 0.10.0
libtpu: 0.0.40
codegen_flags: <defaults>
</compile_context>

<pallas_src>
import functools

import jax
import jax.numpy as jnp
from jax import lax
from jax.experimental import pallas as pl
from jax.experimental.pallas import tpu as pltpu


_CDT = jnp.bfloat16     # MXU input dtype
_LANES = 128            # channel padding granularity (lane width)
_ROWS3X3 = 256          # target accumulator rows per 3x3-conv grid step


def _select_hw_params():
    """Per-generation (row tile, channel tile, scoped VMEM limit)."""
    kind = ""
    try:
        kind = jax.devices()[0].device_kind.lower()
    except Exception:
        pass
    if ("v5 lite" in kind) or ("v5e" in kind) or ("v5litepod" in kind):
        tm, tc, vmem = 256, 256, 96 * 2**20     # 1 vst slot, no bf16 VALU -> smaller tiles
    elif "v6" in kind:
        tm, tc, vmem = 1024, 512, 96 * 2**20    # 128 MiB VMEM -> big row tiles
    elif "v7" in kind:
        tm, tc, vmem = 512, 512, 40 * 2**20     # 64 MiB VMEM / TensorCore
    else:
        tm, tc, vmem = 512, 512, 48 * 2**20
    try:
        cap = pltpu.get_tpu_info().vmem_capacity_bytes
        vmem = max(32 * 2**20, min(vmem, cap - 16 * 2**20))
    except Exception:
        pass
    return tm, tc, vmem


_TM, _TC, _VMEM_LIMIT = _select_hw_params()


def _params(semantics):
    return pltpu.CompilerParams(dimension_semantics=semantics,
                                vmem_limit_bytes=_VMEM_LIMIT)


# ----------------------------- Pallas kernels -----------------------------

def _mm_bn_kernel(x_ref, w_ref, s_ref, b_ref, o_ref, *, relu):
    """out = [relu]((x @ w) * scale + bias)   (BN folded to scale/bias)."""
    acc = jnp.dot(x_ref[...], w_ref[...], preferred_element_type=jnp.float32)
    out = acc * s_ref[...] + b_ref[...]
    if relu:
        out = jnp.maximum(out, 0.0)
    o_ref[...] = out.astype(o_ref.dtype)


def _mm_bn_add_relu_kernel(x_ref, w_ref, s_ref, b_ref, r_ref, o_ref):
    """out = relu((x @ w) * scale + bias + residual)   (identity shortcut)."""
    acc = jnp.dot(x_ref[...], w_ref[...], preferred_element_type=jnp.float32)
    out = acc * s_ref[...] + b_ref[...] + r_ref[...].astype(jnp.float32)
    o_ref[...] = jnp.maximum(out, 0.0).astype(o_ref.dtype)


def _mm2_bn_add_relu_kernel(x_ref, w_ref, s_ref, b_ref,
                            y_ref, v_ref, t_ref, c_ref, o_ref):
    """out = relu((x@w)*s + b + (y@v)*t + c)  -- conv3+bn3 and shortcut conv+bn fused."""
    main = jnp.dot(x_ref[...], w_ref[...], preferred_element_type=jnp.float32)
    main = main * s_ref[...] + b_ref[...]
    sc = jnp.dot(y_ref[...], v_ref[...], preferred_element_type=jnp.float32)
    sc = sc * t_ref[...] + c_ref[...]
    o_ref[...] = jnp.maximum(main + sc, 0.0).astype(o_ref.dtype)


def _conv3x3_bn_relu_kernel(*refs, taps, nphase, tho, wph, wo):
    """Fused 3x3 conv + BN + ReLU for one (Cout tile, image, row tile).

    refs = (phase_0 .. phase_{nphase-1}, w(9,Cin,tc), scale, bias, out)
    Each of the 9 taps reads a contiguous (tho*Wph, Cin) slab of one resident
    phase and accumulates into a LOCAL value (no VMEM scratch RMW).  The
    epilogue compacts the Wph garbage columns down to Wo in VMEM and stores a
    lane-dense (tho, Wo, tc) output block.
    """
    phase_refs = refs[:nphase]
    w_ref, s_ref, b_ref, o_ref = refs[nphase:]
    m2 = tho * wph
    base = pl.program_id(2) * m2                         # row-tile offset into the phase

    acc = None
    for t, (p_idx, shift) in enumerate(taps):            # 9 taps, static unroll
        x = phase_refs[p_idx][0, pl.ds(base + shift, m2), :]   # (m2, Cin), contiguous
        d = jnp.dot(x, w_ref[t], preferred_element_type=jnp.float32)
        acc = d if acc is None else acc + d

    y = jnp.maximum(acc * s_ref[...] + b_ref[...], 0.0)  # f32 epilogue
    for r in range(tho):                                 # Wph -> Wo compaction in VMEM
        o_ref[0, r, :, :] = y[r * wph: r * wph + wo, :].astype(o_ref.dtype)


# ---------------------------- pallas_call wrappers -------------------------

def _mm_bn(x, w, scale, bias, *, relu, out_dtype):
    M, K = x.shape
    C = w.shape[1]
    tm, tc = min(_TM, M), min(_TC, C)
    grid = (pl.cdiv(C, tc), pl.cdiv(M, tm))    # channel tiles outer -> weights stay resident
    return pl.pallas_call(
        functools.partial(_mm_bn_kernel, relu=relu),
        out_shape=jax.ShapeDtypeStruct((M, C), out_dtype),
        grid_spec=pltpu.PrefetchScalarGridSpec(
            num_scalar_prefetch=0, grid=grid,
            in_specs=[
                pl.BlockSpec((tm, K), lambda co, m: (m, 0)),
                pl.BlockSpec((K, tc), lambda co, m: (0, co)),
                pl.BlockSpec((1, tc), lambda co, m: (0, co)),
                pl.BlockSpec((1, tc), lambda co, m: (0, co)),
            ],
            out_specs=pl.BlockSpec((tm, tc), lambda co, m: (m, co)),
        ),
        compiler_params=_params(("parallel", "parallel")),
    )(x, w, scale, bias)


def _mm_bn_add_relu(x, w, scale, bias, res, *, out_dtype):
    M, K = x.shape
    C = w.shape[1]
    tm, tc = min(_TM, M), min(_TC, C)
    grid = (pl.cdiv(C, tc), pl.cdiv(M, tm))
    return pl.pallas_call(
        _mm_bn_add_relu_kernel,
        out_shape=jax.ShapeDtypeStruct((M, C), out_dtype),
        grid_spec=pltpu.PrefetchScalarGridSpec(
            num_scalar_prefetch=0, grid=grid,
            in_specs=[
                pl.BlockSpec((tm, K), lambda co, m: (m, 0)),
                pl.BlockSpec((K, tc), lambda co, m: (0, co)),
                pl.BlockSpec((1, tc), lambda co, m: (0, co)),
                pl.BlockSpec((1, tc), lambda co, m: (0, co)),
                pl.BlockSpec((tm, tc), lambda co, m: (m, co)),
            ],
            out_specs=pl.BlockSpec((tm, tc), lambda co, m: (m, co)),
        ),
        compiler_params=_params(("parallel", "parallel")),
    )(x, w, scale, bias, res)


def _mm2_bn_add_relu(x, w, s, b, y, v, t, c, *, out_dtype):
    M, K1 = x.shape
    K2 = y.shape[1]
    C = w.shape[1]
    tm, tc = min(_TM, M), min(_TC, C)
    grid = (pl.cdiv(C, tc), pl.cdiv(M, tm))
    return pl.pallas_call(
        _mm2_bn_add_relu_kernel,
        out_shape=jax.ShapeDtypeStruct((M, C), out_dtype),
        grid_spec=pltpu.PrefetchScalarGridSpec(
            num_scalar_prefetch=0, grid=grid,
            in_specs=[
                pl.BlockSpec((tm, K1), lambda co, m: (m, 0)),
                pl.BlockSpec((K1, tc), lambda co, m: (0, co)),
                pl.BlockSpec((1, tc), lambda co, m: (0, co)),
                pl.BlockSpec((1, tc), lambda co, m: (0, co)),
                pl.BlockSpec((tm, K2), lambda co, m: (m, 0)),
                pl.BlockSpec((K2, tc), lambda co, m: (0, co)),
                pl.BlockSpec((1, tc), lambda co, m: (0, co)),
                pl.BlockSpec((1, tc), lambda co, m: (0, co)),
            ],
            out_specs=pl.BlockSpec((tm, tc), lambda co, m: (m, co)),
        ),
        compiler_params=_params(("parallel", "parallel")),
    )(x, w, s, b, y, v, t, c)


def _conv3x3_bn_relu(h1_nhwc, w_oihw, scale, bias, stride, *, out_dtype):
    """3x3 / pad=1 / stride conv + BN + ReLU; im2col and column compaction fused in-kernel."""
    N, H, W, C = h1_nhwc.shape           # C already lane-padded
    Cout = w_oihw.shape[0]               # already lane-padded
    s = stride
    Ho = (H + 2 - 3) // s + 1
    Wo = (W + 2 - 3) // s + 1
    off = (3 - 1) // s                   # max in-phase tap offset
    Wph = Wo + off
    tho = max(1, min(Ho, _ROWS3X3 // Wph))    # output rows per grid step
    Mt = pl.cdiv(Ho, tho)
    Hph = Mt * tho + off + 1             # slack rows: every row tile's taps stay in-bounds
    Hp, Wp = s * Hph, s * Wph
    assert Hp >= H + 2 and Wp >= W + 2, (Hp, Wp, H, W)
    assert (Mt * tho + off) * Wph + off <= Hph * Wph   # worst-case flat-slab read bound

    # 1x-traffic relayout in XLA glue: pad, then split into s*s spatial phases.
    xp = jnp.pad(h1_nhwc, ((0, 0), (1, Hp - H - 1), (1, Wp - W - 1), (0, 0)))
    phases = [xp[:, p::s, q::s, :].reshape(N, Hph * Wph, C)
              for p in range(s) for q in range(s)]
    # Static tap schedule: tap (dh, dw) -> (phase index, flat shift inside that phase).
    taps = tuple(((dh % s) * s + (dw % s), (dh // s) * Wph + (dw // s))
                 for dh in range(3) for dw in range(3))
    w9 = jnp.transpose(w_oihw, (2, 3, 1, 0)).reshape(9, C, Cout).astype(_CDT)

    L = Hph * Wph
    tc = min(_TC, Cout)
    grid = (pl.cdiv(Cout, tc), N, Mt)    # channel outer (weights resident), row tiles inner

    phase_spec = pl.BlockSpec((1, L, C), lambda co, n, m: (n, 0, 0))
    return pl.pallas_call(
        functools.partial(_conv3x3_bn_relu_kernel, taps=taps, nphase=len(phases),
                          tho=tho, wph=Wph, wo=Wo),
        out_shape=jax.ShapeDtypeStruct((N, Ho, Wo, Cout), out_dtype),
        grid_spec=pltpu.PrefetchScalarGridSpec(
            num_scalar_prefetch=0, grid=grid,
            in_specs=[phase_spec] * len(phases) + [
                pl.BlockSpec((9, C, tc), lambda co, n, m: (0, 0, co)),
                pl.BlockSpec((1, tc), lambda co, n, m: (0, co)),
                pl.BlockSpec((1, tc), lambda co, n, m: (0, co)),
            ],
            out_specs=pl.BlockSpec((1, tho, Wo, tc), lambda co, n, m: (n, m, 0, co)),
        ),
        compiler_params=_params(("parallel", "parallel", "parallel")),
    )(*phases, w9, scale, bias)


# ------------------------------ params / glue -------------------------------

def _pad_axis(a, axis, mult=_LANES):
    c = a.shape[axis]
    cp = -(-c // mult) * mult
    if cp == c:
        return a
    pads = [(0, 0)] * a.ndim
    pads[axis] = (0, cp - c)
    return jnp.pad(a, pads)


def _bn_fold(bn, eps=1e-5):
    scale = bn["gamma"] / jnp.sqrt(bn["var"] + eps)
    bias = bn["beta"] - bn["mean"] * scale
    scale = _pad_axis(scale.reshape(1, -1).astype(jnp.float32), 1)
    bias = _pad_axis(bias.reshape(1, -1).astype(jnp.float32), 1)
    return scale, bias


def _w1x1(w):
    """(O, I, 1, 1) conv weight -> lane-padded (I_pad, O_pad) bf16 matrix."""
    m = w[:, :, 0, 0].T
    return _pad_axis(_pad_axis(m, 0), 1).astype(_CDT)


def init_bottleneck_params(key, in_planes, planes, stride=1):
    expansion = 4
    out_planes = expansion * planes
    keys = jax.random.split(key, 8)

    def conv_w(k, cout, cin, kh, kw):
        fan_in = cin * kh * kw
        bound = 1.0 / jnp.sqrt(jnp.float32(fan_in))
        return jax.random.uniform(k, (cout, cin, kh, kw), jnp.float32, -bound, bound)

    def bn_p(k, c):
        g = jax.random.uniform(k, (c,), jnp.float32, 0.5, 1.5)
        b = jax.random.uniform(jax.random.fold_in(k, 1), (c,), jnp.float32, -0.5, 0.5)
        return dict(gamma=g, beta=b,
                    mean=jnp.zeros((c,), jnp.float32),
                    var=jnp.ones((c,), jnp.float32))

    params = {
        "conv1": conv_w(keys[0], planes, in_planes, 1, 1),
        "bn1": bn_p(keys[1], planes),
        "conv2": conv_w(keys[2], planes, planes, 3, 3),
        "bn2": bn_p(keys[3], planes),
        "conv3": conv_w(keys[4], out_planes, planes, 1, 1),
        "bn3": bn_p(keys[5], out_planes),
        "stride": stride,
    }
    if stride != 1 or in_planes != out_planes:
        params["sc_conv"] = conv_w(keys[6], out_planes, in_planes, 1, 1)
        params["sc_bn"] = bn_p(keys[7], out_planes)
    return params


def bottleneck_forward(params, x_nchw):
    # TODO(synk): when blocks are stacked, keep activations NHWC between blocks
    # and convert only at network entry/exit to avoid per-block transposes.
    stride = params["stride"]
    out_planes = params["conv3"].shape[0]

    x = jnp.transpose(x_nchw, (0, 2, 3, 1)).astype(_CDT)          # NHWC, bf16
    x = _pad_axis(x, 3)                                           # lane-pad input channels
    N, H, W, Cin_p = x.shape
    Ho = (H + 2 - 3) // stride + 1
    Wo = (W + 2 - 3) // stride + 1

    # conv1 (1x1) + bn1 + relu
    w1 = _w1x1(params["conv1"])
    s1, b1 = _bn_fold(params["bn1"])
    h1 = _mm_bn(x.reshape(N * H * W, Cin_p), w1, s1, b1, relu=True, out_dtype=_CDT)
    planes_p = h1.shape[1]
    h1 = h1.reshape(N, H, W, planes_p)

    # conv2 (3x3, stride, pad=1) + bn2 + relu  -- im2col + column compaction fused in-kernel
    w2 = _pad_axis(_pad_axis(params["conv2"], 0), 1)              # pad O and I dims
    s2, b2 = _bn_fold(params["bn2"])
    h2 = _conv3x3_bn_relu(h1, w2, s2, b2, stride, out_dtype=_CDT) # (N, Ho, Wo, planes_p)
    h2 = h2.reshape(N * Ho * Wo, planes_p)

    # conv3 (1x1) + bn3 + shortcut + add + relu, all fused in one kernel
    w3 = _w1x1(params["conv3"])
    s3, b3 = _bn_fold(params["bn3"])
    out_p = w3.shape[1]
    if "sc_conv" in params:
        # TODO(synk): the strided spatial subsample still materializes in XLA;
        # fusing it needs a 2-axis strided in-kernel gather + relayout.
        xs = x[:, ::stride, ::stride, :].reshape(N * Ho * Wo, Cin_p)
        wsc = _w1x1(params["sc_conv"])
        ssc, bsc = _bn_fold(params["sc_bn"])
        out = _mm2_bn_add_relu(h2, w3, s3, b3, xs, wsc, ssc, bsc,
                               out_dtype=jnp.float32)
    else:
        res = x.reshape(N * Ho * Wo, out_p)                       # identity: Cin_p == out_p
        out = _mm_bn_add_relu(h2, w3, s3, b3, res, out_dtype=jnp.float32)

    out = out.reshape(N, Ho, Wo, out_p)
    return jnp.transpose(out, (0, 3, 1, 2))[:, :out_planes]       # NCHW, drop lane pad


# ----------------------- pure-JAX reference (for check) --------------------

def reference_forward(params, x_nchw):
    def conv(x, w, stride, pad):
        return lax.conv_general_dilated(
            x, w, (stride, stride), pad, dimension_numbers=("NCHW", "OIHW", "NCHW"))

    def bn(x, p, eps=1e-5):
        scale = p["gamma"] / jnp.sqrt(p["var"] + eps)
        bias = p["beta"] - p["mean"] * scale
        return x * scale[None, :, None, None] + bias[None, :, None, None]

    s = params["stride"]
    out = jax.nn.relu(bn(conv(x_nchw, params["conv1"], 1, "VALID"), params["bn1"]))
    out = jax.nn.relu(bn(conv(out, params["conv2"], s, ((1, 1), (1, 1))), params["bn2"]))
    out = bn(conv(out, params["conv3"], 1, "VALID"), params["bn3"])
    if "sc_conv" in params:
        sc = bn(conv(x_nchw, params["sc_conv"], s, "VALID"), params["sc_bn"])
    else:
        sc = x_nchw
    return jax.nn.relu(out + sc)


# --------------------------------- main ------------------------------------

def _quantize_bf16(a):
    return a.astype(jnp.bfloat16).astype(jnp.float32)


if __name__ == "__main__":
    key = jax.random.PRNGKey(0)

    configs = [
        # (N, Cin, H, W, planes, stride)
        (2, 8, 16, 16, 4, 2),    # downsample block (shortcut conv, stride 2)
        (2, 16, 8, 8, 4, 1),     # identity-shortcut block (stride 1)
        (2, 16, 32, 32, 4, 1),   # identity block exercising multiple conv2 row tiles
    ]
    for i, (N, Cin, H, W, planes, stride) in enumerate(configs):
        kx, kp = jax.random.split(jax.random.fold_in(key, i))
        x = jax.random.normal(kx, (N, Cin, H, W), jnp.float32)
        params = init_bottleneck_params(kp, Cin, planes, stride)

        out = jax.block_until_ready(bottleneck_forward(params, x))

        # The kernels use bf16 MXU inputs, so compare against a reference that
        # also quantizes the conv weights / input to bf16 (f32 compute).
        params_q = dict(params)
        for name in ("conv1", "conv2", "conv3", "sc_conv"):
            if name in params_q:
                params_q[name] = _quantize_bf16(params_q[name])
        ref = reference_forward(params_q, _quantize_bf16(x))

        assert out.shape == ref.shape, (out.shape, ref.shape)
        max_err = float(jnp.max(jnp.abs(out - ref)))
        ref_scale = float(jnp.max(jnp.abs(ref))) + 1e-6
        if max_err > 3e-2 * ref_scale:
            raise AssertionError(
                f"config {i}: Pallas vs reference mismatch: "
                f"max abs err {max_err} (ref scale {ref_scale})")

    print("KERNEL_OK")
</pallas_src>

<mosaic_0001>
module attributes {stable_mosaic.version = 11 : i64} {
  func.func @_mm_bn_kernel(%arg0: i32, %arg1: i32, %arg2: memref<512x128xbf16, #tpu.memory_space<vmem>>, %arg3: memref<128x128xbf16, #tpu.memory_space<vmem>>, %arg4: memref<1x128xf32, #tpu.memory_space<vmem>>, %arg5: memref<1x128xf32, #tpu.memory_space<vmem>>, %arg6: memref<512x128xbf16, #tpu.memory_space<vmem>>) attributes {dimension_semantics = [#tpu.dimension_semantics<parallel>, #tpu.dimension_semantics<parallel>], iteration_bounds = array<i64: 1, 1>, scalar_prefetch = 0 : i64, scratch_operands = 0 : i64, tpu.core_type = #tpu.core_type<tc>, window_params = [{transform_indices = @transform_0, window_bounds = array<i64: 512, 128>}, {transform_indices = @transform_1, window_bounds = array<i64: 128, 128>}, {transform_indices = @transform_2, window_bounds = array<i64: 1, 128>}, {transform_indices = @transform_3, window_bounds = array<i64: 1, 128>}, {transform_indices = @transform_4, window_bounds = array<i64: 512, 128>}]} {
    %c0 = arith.constant 0 : index
    %c0_0 = arith.constant 0 : index
    %0 = vector.load %arg2[%c0, %c0_0] : memref<512x128xbf16, #tpu.memory_space<vmem>>, vector<512x128xbf16>
    %c0_1 = arith.constant 0 : index
    %c0_2 = arith.constant 0 : index
    %1 = vector.load %arg3[%c0_1, %c0_2] : memref<128x128xbf16, #tpu.memory_space<vmem>>, vector<128x128xbf16>
    %cst = arith.constant dense<0.000000e+00> : vector<512x128xf32>
    %2 = tpu.matmul %0, %1, %cst {dimension_numbers = #tpu.dot_dimension_numbers<[1], [0], [0], [1], [0, 0, 1, 1], [], []>} : vector<512x128xbf16>, vector<128x128xbf16>, vector<512x128xf32> -> vector<512x128xf32>
    %c0_3 = arith.constant 0 : index
    %c0_4 = arith.constant 0 : index
    %3 = vector.load %arg4[%c0_3, %c0_4] : memref<1x128xf32, #tpu.memory_space<vmem>>, vector<1x128xf32>
    %4 = vector.broadcast %3 : vector<1x128xf32> to vector<512x128xf32>
    %5 = arith.mulf %2, %4 : vector<512x128xf32>
    %c0_5 = arith.constant 0 : index
    %c0_6 = arith.constant 0 : index
    %6 = vector.load %arg5[%c0_5, %c0_6] : memref<1x128xf32, #tpu.memory_space<vmem>>, vector<1x128xf32>
    %7 = vector.broadcast %6 : vector<1x128xf32> to vector<512x128xf32>
    %8 = arith.addf %5, %7 : vector<512x128xf32>
    %cst_7 = arith.constant 0.000000e+00 : f32
    %9 = vector.broadcast %cst_7 : f32 to vector<512x128xf32>
    %10 = arith.maximumf %8, %9 : vector<512x128xf32>
    %11 = arith.truncf %10 : vector<512x128xf32> to vector<512x128xbf16>
    %c0_8 = arith.constant 0 : index
    %c0_9 = arith.constant 0 : index
    %12 = vector.load %arg6[%c0_8, %c0_9] : memref<512x128xbf16, #tpu.memory_space<vmem>>, vector<512x128xbf16>
    tpu.vector_store %arg6[%c0_8, %c0_9], %11 {strides = array<i32>} : memref<512x128xbf16, #tpu.memory_space<vmem>>, vector<512x128xbf16>,
    return
  }
  func.func @transform_0(%arg0: i32, %arg1: i32) -> (i32, i32) {
    %c0_i32 = arith.constant 0 : i32
    %c0_i32_0 = arith.constant 0 : i32
    return %arg1, %c0_i32 : i32, i32
  }
  func.func @transform_1(%arg0: i32, %arg1: i32) -> (i32, i32) {
    %c0_i32 = arith.constant 0 : i32
    %c0_i32_0 = arith.constant 0 : i32
    return %c0_i32, %arg0 : i32, i32
  }
  func.func @transform_2(%arg0: i32, %arg1: i32) -> (i32, i32) {
    %c0_i32 = arith.constant 0 : i32
    %c0_i32_0 = arith.constant 0 : i32
    return %c0_i32, %arg0 : i32, i32
  }
  func.func @transform_3(%arg0: i32, %arg1: i32) -> (i32, i32) {
    %c0_i32 = arith.constant 0 : i32
    %c0_i32_0 = arith.constant 0 : i32
    return %c0_i32, %arg0 : i32, i32
  }
  func.func @transform_4(%arg0: i32, %arg1: i32) -> (i32, i32) {
    %c0_i32 = arith.constant 0 : i32
    return %arg1, %arg0 : i32, i32
  }
}

</mosaic_0001>

<bundles_post_ra>
// kernel: tpu_custom_call.1
= control target key start
LH: loop header
LB: loop body
LE: loop exit
PB: predicated region body
PF: predicated region fallthrough
CT: control target
= control target key end

     0   :  { %9 = vsyncpa [#allocation3], 0  ;;  %s2027_s0 = inlined_call_operand.hbm [shape: bf16[512,128], index: 0, kind: input, shape index: {}]   ;;  %s2028_s1 = inlined_call_operand.hbm [shape: bf16[128,128], index: 1, kind: input, shape index: {}]   ;;  %s2029_s2 = inlined_call_operand.vmem [shape: f32[1,128], index: 2, kind: input, shape index: {}]   ;;  %s2030_s3 = inlined_call_operand.vmem [shape: f32[1,128], index: 3, kind: input, shape index: {}]   ;;  %s2031_s4 = inlined_call_operand.hbm [shape: bf16[512,128], index: 4, kind: output, shape index: {}]  }
   0x1   :  { %10 = vsyncpa [#allocation6], 0 }
   0x2   :  { %11 = vsyncpa [#allocation4], 0  ;;  %s1814_s15 = smov [#allocation2]   ;;  %s1742_s19 = scalar_lea.hbm %s2027_s0, 4096 }
   0x3   :  { %s17_s16 = sshll.u32 %s1814_s15, 4  ;;  %p1743_p0 = scmp.ne.s32.totalorder %s2027_s0, %s1742_s19  ;;  %s18_s16 = int_to_ptr.vmem [resolvable:$true] %s17_s16 }
   0x4   :  { %p1746_p1 = scmp.lt.u32.totalorder %s1742_s19, %s2027_s0 }
   0x6   :  { %p1748_p2 = pnand %p1746_p1, %p1743_p0 }
   0x8   :  { %1751 = shalt.err (!%p1748_p2)
}
   0x9   :  { %s1752_s24 = scalar_lea.vmem %s18_s16, 4096  ;;  %p1757_p4 = scmp.lt.s32.totalorder %s18_s16, %s18_s16 }
   0xa   :  { %p1753_p3 = scmp.ne.s32.totalorder %s18_s16, %s1752_s24  ;;  %p1758_p5 = scmp.lt.s32.totalorder %s1752_s24, %s1752_s24 }
   0xc   :  { %p1759_p6 = por %p1758_p5, %p1757_p4 }
   0xe   :  { %p1760_p7 = pnand %p1759_p6, %p1753_p3 }
  0x10   :  { %1763 = shalt.err (!%p1760_p7)
}
  0x11   :  { %s1815_s25 = smov 64   ;;  %s1816_s26 = smov 4  }
  0x12   :  { %23 = dma.hbm_to_vmem [thread:$0]  %s2027_s0, 4096, %s18_s16, [#allocation3], %s1815_s25, %s1815_s25, %s1816_s26  }
  0x13   :  { %s1817_s29 = smov [#allocation5]   ;;  %s1764_s7 = scalar_lea.hbm %s2028_s1, 1024 }
  0x14   :  { %s29_s30 = sshll.u32 %s1817_s29, 4  ;;  %p1765_p8 = scmp.ne.s32.totalorder %s2028_s1, %s1764_s7  ;;  %s30_s30 = int_to_ptr.vmem [resolvable:$true] %s29_s30 }
  0x15   :  { %p1768_p9 = scmp.lt.u32.totalorder %s1764_s7, %s2028_s1 }
  0x17   :  { %p1770_p10 = pnand %p1768_p9, %p1765_p8 }
  0x19   :  { %1773 = shalt.err (!%p1770_p10)
}
  0x1a   :  { %s1774_s12 = scalar_lea.vmem %s30_s30, 1024  ;;  %p1779_p12 = scmp.lt.s32.totalorder %s30_s30, %s30_s30 }
  0x1b   :  { %p1775_p11 = scmp.ne.s32.totalorder %s30_s30, %s1774_s12  ;;  %p1780_p13 = scmp.lt.s32.totalorder %s1774_s12, %s1774_s12 }
  0x1d   :  { %p1781_p0 = por %p1780_p13, %p1779_p12 }
  0x1f   :  { %p1782_p1 = pnand %p1781_p0, %p1775_p11 }
  0x21   :  { %1785 = shalt.err (!%p1782_p1)
}
  0x22   :  { %35 = dma.hbm_to_vmem [thread:$0]  %s2028_s1, 1024, %s30_s30, [#allocation6], %s1815_s25, %s1815_s25, %s1816_s26  }
  0x23   :  { %1808 = dma.done.wait [#allocation3], 4096  }
  0x24   :  { %1809 = vsyncadd [#allocation3], 4294963200 }
  0x25   :  { %1810 = dma.done.wait [#allocation6], 1024  }
  0x26   :  { %1811 = vsyncadd [#allocation6], 4294966272  ;;  %v1702_v0 = vld [vmem:[#allocation5] sm:$0xff]   ;;  %v1703_v1 = vld [vmem:[#allocation5 + $0x8] sm:$0xff]  }
  0x27   :  { %1601 = vmatprep.subr.bf16.mxu0 %v1702_v0  ;;  %1681 = vmatprep.subr.bf16.mxu1 %v1702_v0  ;;  %v1704_v2 = vld [vmem:[#allocation5 + $0x10] sm:$0xff]   ;;  %v1705_v3 = vld [vmem:[#allocation5 + $0x18] sm:$0xff]   ;;  %v1710_v4 = vld [vmem:[#allocation2] sm:$0xff]  }
  0x28   :  { %1602 = vmatpush3.bf16.msra.mxu0 %v1702_v0  ;;  %1689 = vmatpush3.bf16.msra.mxu1 %v1702_v0  ;;  %v1711_v5 = vld [vmem:[#allocation2 + $0x80] sm:$0xff]   ;;  %v1707_v7 = vld [vmem:[#allocation5 + $0x28] sm:$0xff]   ;;  %v1708_v8 = vld [vmem:[#allocation5 + $0x30] sm:$0xff]  }
  0x29   :  { %1603 = vmatprep.subr.bf16.mxu0 %v1703_v1  ;;  %1682 = vmatprep.subr.bf16.mxu1 %v1703_v1  ;;  %v1706_v6 = vld [vmem:[#allocation5 + $0x20] sm:$0xff]   ;;  %v1709_v9 = vld [vmem:[#allocation5 + $0x38] sm:$0xff]   ;;  %v1712_v10 = vld [vmem:[#allocation2 + $0x8] sm:$0xff]  }
  0x2a   :  { %1617 = vmatprep.mubr.bf16.mxu0 %v1710_v4  ;;  %1649 = vmatprep.mubr.bf16.mxu1 %v1711_v5  ;;  %v1713_v11 = vld [vmem:[#allocation2 + $0x88] sm:$0xff]   ;;  %v1714_v12 = vld [vmem:[#allocation2 + $0x10] sm:$0xff]   ;;  %v1716_v14 = vld [vmem:[#allocation2 + $0x18] sm:$0xff]  }
  0x2b   :  { %v1715_v13 = vld [vmem:[#allocation2 + $0x90] sm:$0xff]   ;;  %v1717_v15 = vld [vmem:[#allocation2 + $0x98] sm:$0xff]   ;;  %v1718_v16 = vld [vmem:[#allocation2 + $0x20] sm:$0xff]  }
  0x2c   :  { %1604 = vmatpush3.bf16.msra.mxu0 %v1703_v1  ;;  %1690 = vmatpush3.bf16.msra.mxu1 %v1703_v1  ;;  %v1719_v17 = vld [vmem:[#allocation2 + $0xa0] sm:$0xff]   ;;  %v1720_v18 = vld [vmem:[#allocation2 + $0x28] sm:$0xff]   ;;  %v1722_v20 = vld [vmem:[#allocation2 + $0x30] sm:$0xff]  }
  0x2d   :  { %1605 = vmatprep.subr.bf16.mxu0 %v1704_v2  ;;  %1683 = vmatprep.subr.bf16.mxu1 %v1704_v2  ;;  %v1721_v19 = vld [vmem:[#allocation2 + $0xa8] sm:$0xff]   ;;  %v1723_v21 = vld [vmem:[#allocation2 + $0xb0] sm:$0xff]   ;;  %v1724_v22 = vld [vmem:[#allocation2 + $0x38] sm:$0xff]  }
  0x2e   :  { %v1725_v23 = vld [vmem:[#allocation2 + $0xb8] sm:$0xff]   ;;  %v1726_v24 = vld [vmem:[#allocation2 + $0x40] sm:$0xff]   ;;  %v1728_v26 = vld [vmem:[#allocation2 + $0x48] sm:$0xff]  }
  0x2f   :  { %v1727_v25 = vld [vmem:[#allocation2 + $0xc0] sm:$0xff]   ;;  %v1729_v27 = vld [vmem:[#allocation2 + $0xc8] sm:$0xff]   ;;  %v1730_v28 = vld [vmem:[#allocation2 + $0x50] sm:$0xff]  }
  0x30   :  { %1606 = vmatpush3.bf16.msra.mxu0 %v1704_v2  ;;  %1691 = vmatpush3.bf16.msra.mxu1 %v1704_v2  ;;  %v1731_v29 = vld [vmem:[#allocation2 + $0xd0] sm:$0xff]   ;;  %v1732_v30 = vld [vmem:[#allocation2 + $0x58] sm:$0xff]   ;;  %v1734_v32 = vld [vmem:[#allocation2 + $0x60] sm:$0xff]  }
  0x31   :  { %1607 = vmatprep.subr.bf16.mxu0 %v1705_v3  ;;  %1684 = vmatprep.subr.bf16.mxu1 %v1705_v3  ;;  %v1733_v31 = vld [vmem:[#allocation2 + $0xd8] sm:$0xff]   ;;  %v1735_v33 = vld [vmem:[#allocation2 + $0xe0] sm:$0xff]   ;;  %v1736_v34 = vld [vmem:[#allocation2 + $0x68] sm:$0xff]  }
  0x32   :  { %v1737_v35 = vld [vmem:[#allocation2 + $0xe8] sm:$0xff]   ;;  %v1738_v36 = vld [vmem:[#allocation2 + $0x70] sm:$0xff]   ;;  %v1740_v38 = vld [vmem:[#allocation2 + $0x78] sm:$0xff]  }
  0x33   :  { %v1739_v37 = vld [vmem:[#allocation2 + $0xf0] sm:$0xff]   ;;  %v1741_v39 = vld [vmem:[#allocation2 + $0xf8] sm:$0xff]   ;;  %v1877_v40 = vld [vmem:[%s2029_s2] ss:$0 sm:$0xff]  ;;  %s1818_s2 = smov [#allocation7]  }
  0x34   :  { %1608 = vmatpush3.bf16.msra.mxu0 %v1705_v3  ;;  %1692 = vmatpush3.bf16.msra.mxu1 %v1705_v3  ;;  %v1882_v42 = vld [vmem:[%s2030_s3] ss:$0 sm:$0xff]  ;;  %s1187_s3 = sshll.u32 %s1818_s2, 4  ;;  %s1188_s3 = int_to_ptr.vmem [resolvable:$true] %s1187_s3 }
  0x35   :  { %1609 = vmatprep.subr.bf16.mxu0 %v1706_v6  ;;  %1685 = vmatprep.subr.bf16.mxu1 %v1706_v6  ;;  %s1786_s17 = scalar_lea.vmem %s1188_s3, 4096  ;;  %p1791_p3 = scmp.lt.s32.totalorder %s1188_s3, %s1188_s3 }
  0x36   :  { %p1787_p2 = scmp.ne.s32.totalorder %s1188_s3, %s1786_s17  ;;  %p1792_p4 = scmp.lt.s32.totalorder %s1786_s17, %s1786_s17 }
  0x38   :  { %1610 = vmatpush3.bf16.msra.mxu0 %v1706_v6  ;;  %1693 = vmatpush3.bf16.msra.mxu1 %v1706_v6  ;;  %p1793_p5 = por %p1792_p4, %p1791_p3 }
  0x39   :  { %1611 = vmatprep.subr.bf16.mxu0 %v1707_v7  ;;  %1686 = vmatprep.subr.bf16.mxu1 %v1707_v7 }
  0x3a   :  { %p1794_p6 = pnand %p1793_p5, %p1787_p2 }
  0x3c   :  { %1612 = vmatpush3.bf16.msra.mxu0 %v1707_v7  ;;  %1694 = vmatpush3.bf16.msra.mxu1 %v1707_v7 }
  0x3d   :  { %1613 = vmatprep.subr.bf16.mxu0 %v1708_v8  ;;  %1687 = vmatprep.subr.bf16.mxu1 %v1708_v8 }
  0x40   :  { %1614 = vmatpush3.bf16.msra.mxu0 %v1708_v8  ;;  %1695 = vmatpush3.bf16.msra.mxu1 %v1708_v8 }
  0x41   :  { %1615 = vmatprep.subr.bf16.mxu0 %v1709_v9  ;;  %1688 = vmatprep.subr.bf16.mxu1 %v1709_v9 }
  0x44   :  { %1616 = vmatpush3.bf16.msra.mxu0 %v1709_v9  ;;  %1696 = vmatpush3.bf16.msra.mxu1 %v1709_v9 }
  0x47   :  { %1618 = vmatmul.mubr.bf16.vlgmr.msra.gmra.mrb[0].mxu0 %v1712_v10  ;;  %1650 = vmatmul.mubr.bf16.vlgmr.msra.gmra.mrb[0].mxu1 %v1713_v11 }
  0x48   :  { %1621 = vmatprep.mubr.bf16.mxu0 %v1714_v12  ;;  %1653 = vmatprep.mubr.bf16.mxu1 %v1715_v13 }
  0x4f   :  { %1622 = vmatmul.mubr.bf16.gmra.mrb[4].mxu0 %v1716_v14  ;;  %1654 = vmatmul.mubr.bf16.gmra.mrb[4].mxu1 %v1717_v15 }
  0x50   :  { %1625 = vmatprep.mubr.bf16.mxu0 %v1718_v16  ;;  %1657 = vmatprep.mubr.bf16.mxu1 %v1719_v17 }
  0x57   :  { %1626 = vmatmul.mubr.bf16.gmra.mrb[8].mxu0 %v1720_v18  ;;  %1658 = vmatmul.mubr.bf16.gmra.mrb[8].mxu1 %v1721_v19 }
  0x58   :  { %1629 = vmatprep.mubr.bf16.mxu0 %v1722_v20  ;;  %1661 = vmatprep.mubr.bf16.mxu1 %v1723_v21 }
  0x5f   :  { %1630 = vmatmul.mubr.bf16.gmra.mrb[12].mxu0 %v1724_v22  ;;  %1662 = vmatmul.mubr.bf16.gmra.mrb[12].mxu1 %v1725_v23 }
  0x60   :  { %1633 = vmatprep.mubr.bf16.mxu0 %v1726_v24  ;;  %1665 = vmatprep.mubr.bf16.mxu1 %v1727_v25 }
  0x67   :  { %1634 = vmatmul.mubr.bf16.gmra.mrb[16].mxu0 %v1728_v26  ;;  %1666 = vmatmul.mubr.bf16.gmra.mrb[16].mxu1 %v1729_v27 }
  0x68   :  { %1637 = vmatprep.mubr.bf16.mxu0 %v1730_v28  ;;  %1669 = vmatprep.mubr.bf16.mxu1 %v1731_v29 }
  0x6f   :  { %1638 = vmatmul.mubr.bf16.gmra.mrb[20].mxu0 %v1732_v30  ;;  %1670 = vmatmul.mubr.bf16.gmra.mrb[20].mxu1 %v1733_v31 }
  0x70   :  { %1641 = vmatprep.mubr.bf16.mxu0 %v1734_v32  ;;  %1673 = vmatprep.mubr.bf16.mxu1 %v1735_v33 }
  0x77   :  { %1642 = vmatmul.mubr.bf16.gmra.mrb[24].mxu0 %v1736_v34  ;;  %1674 = vmatmul.mubr.bf16.gmra.mrb[24].mxu1 %v1737_v35 }
  0x78   :  { %1645 = vmatprep.mubr.bf16.mxu0 %v1738_v36  ;;  %1677 = vmatprep.mubr.bf16.mxu1 %v1739_v37 }
  0x7f   :  { %1646 = vmatmul.mubr.bf16.gmra.mrb[28].mxu0 %v1740_v38  ;;  %1678 = vmatmul.mubr.bf16.gmra.mrb[28].mxu1 %v1741_v39 }
 0x11a   :  { %v1619_v41 = vpop.f32.mrb[0].mxu0  ;;  %v1651_v43 = vpop.f32.mrb[0].mxu1 }
 0x11b   :  { %v665_v44 = vmul.f32 %v1619_v41, %v1877_v40  ;;  %v697_v45 = vmul.f32 %v1651_v43, %v1877_v40  ;;  %v401_v46 = vpop.f32.mrb[1].mxu0  ;;  %v529_v47 = vpop.f32.mrb[1].mxu1 }
 0x11c   :  { %v663_v48 = vmul.f32 %v1877_v40, %v401_v46  ;;  %v695_v49 = vmul.f32 %v1877_v40, %v529_v47  ;;  %v1620_v50 = vpop.f32.mrb[2].mxu0  ;;  %v1652_v51 = vpop.f32.mrb[2].mxu1 }
 0x11d   :  { %v736_v52 = vadd.f32 %v1882_v42, %v665_v44  ;;  %v768_v53 = vadd.f32 %v1882_v42, %v697_v45  ;;  %v666_v54 = vmul.f32 %v1620_v50, %v1877_v40  ;;  %v698_v55 = vmul.f32 %v1652_v51, %v1877_v40  ;;  %v404_v56 = vpop.f32.mrb[3].mxu0  ;;  %v532_v57 = vpop.f32.mrb[3].mxu1 }
 0x11e   :  { %v734_v58 = vadd.f32 %v1882_v42, %v663_v48  ;;  %v766_v59 = vadd.f32 %v1882_v42, %v695_v49  ;;  %v664_v60 = vmul.f32 %v1877_v40, %v404_v56  ;;  %v696_v61 = vmul.f32 %v1877_v40, %v532_v57 }
 0x11f   :  { %v737_v62 = vadd.f32 %v1882_v42, %v666_v54  ;;  %v769_v63 = vadd.f32 %v1882_v42, %v698_v55  ;;  %v800_v2 = vmax.f32 %v736_v52, 0.0  ;;  %v832_v3 = vmax.f32 %v768_v53, 0.0 }
 0x120   :  { %v735_v0 = vadd.f32 %v1882_v42, %v664_v60  ;;  %v767_v1 = vadd.f32 %v1882_v42, %v696_v61  ;;  %v798_v6 = vmax.f32 %v734_v58, 0.0  ;;  %v830_v7 = vmax.f32 %v766_v59, 0.0 }
 0x121   :  { %v801_v4 = vmax.f32 %v737_v62, 0.0  ;;  %v833_v5 = vmax.f32 %v769_v63, 0.0 }
 0x122   :  { %v799_v8 = vmax.f32 %v735_v0, 0.0  ;;  %v831_v9 = vmax.f32 %v767_v1, 0.0  ;;  %v1623_v10 = vpop.f32.mrb[4].mxu0  ;;  %v1655_v11 = vpop.f32.mrb[4].mxu1 }
 0x123   :  { %v1378_v12 = vpack.c.bf16 %v801_v4, %v800_v2  ;;  %v1458_v13 = vpack.c.bf16 %v833_v5, %v832_v3  ;;  %v669_v14 = vmul.f32 %v1623_v10, %v1877_v40  ;;  %v701_v15 = vmul.f32 %v1655_v11, %v1877_v40  ;;  %v417_v16 = vpop.f32.mrb[5].mxu0  ;;  %v545_v17 = vpop.f32.mrb[5].mxu1 }
 0x124   :  { %v1373_v18 = vpack.c.bf16 %v799_v8, %v798_v6  ;;  %v1453_v19 = vpack.c.bf16 %v831_v9, %v830_v7  ;;  %v667_v20 = vmul.f32 %v1877_v40, %v417_v16  ;;  %v699_v21 = vmul.f32 %v1877_v40, %v545_v17  ;;  %v1624_v22 = vpop.f32.mrb[6].mxu0  ;;  %v1656_v23 = vpop.f32.mrb[6].mxu1 }
 0x125   :  { %1530 = vst [vmem:[#allocation7 + $0x8] sm:$0xff] %v1378_v12   ;;  %1546 = vst [vmem:[#allocation7 + $0x88] sm:$0xff] %v1458_v13   ;;  %v740_v24 = vadd.f32 %v1882_v42, %v669_v14  ;;  %v772_v25 = vadd.f32 %v1882_v42, %v701_v15  ;;  %v670_v26 = vmul.f32 %v1624_v22, %v1877_v40  ;;  %v420_v28 = vpop.f32.mrb[7].mxu0  ;;  %v548_v29 = vpop.f32.mrb[7].mxu1 }
 0x126   :  { %v702_v27 = vmul.f32 %v1656_v23, %v1877_v40  ;;  %1374 = vst [vmem:[#allocation7] sm:$0xff] %v1373_v18   ;;  %1545 = vst [vmem:[#allocation7 + $0x80] sm:$0xff] %v1453_v19   ;;  %v738_v30 = vadd.f32 %v1882_v42, %v667_v20  ;;  %v770_v31 = vadd.f32 %v1882_v42, %v699_v21 }
 0x127   :  { %v668_v32 = vmul.f32 %v1877_v40, %v420_v28  ;;  %v700_v33 = vmul.f32 %v1877_v40, %v548_v29  ;;  %v741_v34 = vadd.f32 %v1882_v42, %v670_v26  ;;  %v804_v38 = vmax.f32 %v740_v24, 0.0 }
 0x128   :  { %v773_v35 = vadd.f32 %v1882_v42, %v702_v27  ;;  %v836_v39 = vmax.f32 %v772_v25, 0.0  ;;  %v802_v44 = vmax.f32 %v738_v30, 0.0  ;;  %v834_v45 = vmax.f32 %v770_v31, 0.0 }
 0x129   :  { %v739_v36 = vadd.f32 %v1882_v42, %v668_v32  ;;  %v771_v37 = vadd.f32 %v1882_v42, %v700_v33  ;;  %v805_v41 = vmax.f32 %v741_v34, 0.0 }
 0x12a   :  { %v837_v43 = vmax.f32 %v773_v35, 0.0  ;;  %v1627_v48 = vpop.f32.mrb[8].mxu0  ;;  %v1659_v49 = vpop.f32.mrb[8].mxu1 }
 0x12b   :  { %v803_v46 = vmax.f32 %v739_v36, 0.0  ;;  %v835_v47 = vmax.f32 %v771_v37, 0.0  ;;  %v1388_v50 = vpack.c.bf16 %v805_v41, %v804_v38  ;;  %v673_v52 = vmul.f32 %v1627_v48, %v1877_v40  ;;  %v433_v54 = vpop.f32.mrb[9].mxu0  ;;  %v561_v55 = vpop.f32.mrb[9].mxu1 }
 0x12c   :  { %v1468_v51 = vpack.c.bf16 %v837_v43, %v836_v39  ;;  %v705_v53 = vmul.f32 %v1659_v49, %v1877_v40  ;;  %v671_v58 = vmul.f32 %v1877_v40, %v433_v54  ;;  %v703_v59 = vmul.f32 %v1877_v40, %v561_v55  ;;  %v1628_v60 = vpop.f32.mrb[10].mxu0  ;;  %v1660_v61 = vpop.f32.mrb[10].mxu1 }
 0x12d   :  { %v1383_v56 = vpack.c.bf16 %v803_v46, %v802_v44  ;;  %v1463_v57 = vpack.c.bf16 %v835_v47, %v834_v45  ;;  %1532 = vst [vmem:[#allocation7 + $0x18] sm:$0xff] %v1388_v50   ;;  %v744_v62 = vadd.f32 %v1882_v42, %v673_v52  ;;  %v674_v0 = vmul.f32 %v1628_v60, %v1877_v40  ;;  %v436_v2 = vpop.f32.mrb[11].mxu0  ;;  %v564_v3 = vpop.f32.mrb[11].mxu1 }
 0x12e   :  { %1548 = vst [vmem:[#allocation7 + $0x98] sm:$0xff] %v1468_v51   ;;  %v776_v63 = vadd.f32 %v1882_v42, %v705_v53  ;;  %v706_v1 = vmul.f32 %v1660_v61, %v1877_v40  ;;  %v742_v4 = vadd.f32 %v1882_v42, %v671_v58  ;;  %v774_v5 = vadd.f32 %v1882_v42, %v703_v59 }
 0x12f   :  { %1531 = vst [vmem:[#allocation7 + $0x10] sm:$0xff] %v1383_v56   ;;  %1547 = vst [vmem:[#allocation7 + $0x90] sm:$0xff] %v1463_v57   ;;  %v672_v6 = vmul.f32 %v1877_v40, %v436_v2  ;;  %v704_v7 = vmul.f32 %v1877_v40, %v564_v3  ;;  %v745_v8 = vadd.f32 %v1882_v42, %v674_v0  ;;  %v808_v12 = vmax.f32 %v744_v62, 0.0 }
 0x130   :  { %v777_v9 = vadd.f32 %v1882_v42, %v706_v1  ;;  %v840_v13 = vmax.f32 %v776_v63, 0.0  ;;  %v806_v16 = vmax.f32 %v742_v4, 0.0  ;;  %v838_v17 = vmax.f32 %v774_v5, 0.0 }
 0x131   :  { %v743_v10 = vadd.f32 %v1882_v42, %v672_v6  ;;  %v775_v11 = vadd.f32 %v1882_v42, %v704_v7  ;;  %v809_v14 = vmax.f32 %v745_v8, 0.0 }
 0x132   :  { %v841_v15 = vmax.f32 %v777_v9, 0.0  ;;  %v1631_v20 = vpop.f32.mrb[12].mxu0  ;;  %v1663_v21 = vpop.f32.mrb[12].mxu1 }
 0x133   :  { %v807_v18 = vmax.f32 %v743_v10, 0.0  ;;  %v839_v19 = vmax.f32 %v775_v11, 0.0  ;;  %v1398_v22 = vpack.c.bf16 %v809_v14, %v808_v12  ;;  %v677_v24 = vmul.f32 %v1631_v20, %v1877_v40  ;;  %v449_v26 = vpop.f32.mrb[13].mxu0  ;;  %v577_v27 = vpop.f32.mrb[13].mxu1 }
 0x134   :  { %v1478_v23 = vpack.c.bf16 %v841_v15, %v840_v13  ;;  %v709_v25 = vmul.f32 %v1663_v21, %v1877_v40  ;;  %v675_v30 = vmul.f32 %v1877_v40, %v449_v26  ;;  %v707_v31 = vmul.f32 %v1877_v40, %v577_v27  ;;  %v1632_v32 = vpop.f32.mrb[14].mxu0  ;;  %v1664_v33 = vpop.f32.mrb[14].mxu1 }
 0x135   :  { %v1393_v28 = vpack.c.bf16 %v807_v18, %v806_v16  ;;  %v1473_v29 = vpack.c.bf16 %v839_v19, %v838_v17  ;;  %1534 = vst [vmem:[#allocation7 + $0x28] sm:$0xff] %v1398_v22   ;;  %v748_v34 = vadd.f32 %v1882_v42, %v677_v24  ;;  %v678_v36 = vmul.f32 %v1632_v32, %v1877_v40  ;;  %v452_v38 = vpop.f32.mrb[15].mxu0  ;;  %v580_v39 = vpop.f32.mrb[15].mxu1 }
 0x136   :  { %1550 = vst [vmem:[#allocation7 + $0xa8] sm:$0xff] %v1478_v23   ;;  %v780_v35 = vadd.f32 %v1882_v42, %v709_v25  ;;  %v710_v37 = vmul.f32 %v1664_v33, %v1877_v40  ;;  %v746_v41 = vadd.f32 %v1882_v42, %v675_v30  ;;  %v778_v43 = vadd.f32 %v1882_v42, %v707_v31 }
 0x137   :  { %1533 = vst [vmem:[#allocation7 + $0x20] sm:$0xff] %v1393_v28   ;;  %1549 = vst [vmem:[#allocation7 + $0xa0] sm:$0xff] %v1473_v29   ;;  %v676_v44 = vmul.f32 %v1877_v40, %v452_v38  ;;  %v708_v45 = vmul.f32 %v1877_v40, %v580_v39  ;;  %v749_v46 = vadd.f32 %v1882_v42, %v678_v36  ;;  %v812_v50 = vmax.f32 %v748_v34, 0.0 }
 0x138   :  { %v781_v47 = vadd.f32 %v1882_v42, %v710_v37  ;;  %v844_v51 = vmax.f32 %v780_v35, 0.0  ;;  %v810_v54 = vmax.f32 %v746_v41, 0.0  ;;  %v842_v55 = vmax.f32 %v778_v43, 0.0 }
 0x139   :  { %v747_v48 = vadd.f32 %v1882_v42, %v676_v44  ;;  %v779_v49 = vadd.f32 %v1882_v42, %v708_v45  ;;  %v813_v52 = vmax.f32 %v749_v46, 0.0 }
 0x13a   :  { %v845_v53 = vmax.f32 %v781_v47, 0.0  ;;  %v1635_v58 = vpop.f32.mrb[16].mxu0  ;;  %v1667_v59 = vpop.f32.mrb[16].mxu1 }
 0x13b   :  { %v811_v56 = vmax.f32 %v747_v48, 0.0  ;;  %v843_v57 = vmax.f32 %v779_v49, 0.0  ;;  %v1408_v60 = vpack.c.bf16 %v813_v52, %v812_v50  ;;  %v681_v62 = vmul.f32 %v1635_v58, %v1877_v40  ;;  %v465_v0 = vpop.f32.mrb[17].mxu0  ;;  %v593_v1 = vpop.f32.mrb[17].mxu1 }
 0x13c   :  { %v1488_v61 = vpack.c.bf16 %v845_v53, %v844_v51  ;;  %v713_v63 = vmul.f32 %v1667_v59, %v1877_v40  ;;  %v679_v4 = vmul.f32 %v1877_v40, %v465_v0  ;;  %v711_v5 = vmul.f32 %v1877_v40, %v593_v1  ;;  %v1636_v6 = vpop.f32.mrb[18].mxu0  ;;  %v1668_v7 = vpop.f32.mrb[18].mxu1 }
 0x13d   :  { %v1403_v2 = vpack.c.bf16 %v811_v56, %v810_v54  ;;  %v1483_v3 = vpack.c.bf16 %v843_v57, %v842_v55  ;;  %1536 = vst [vmem:[#allocation7 + $0x38] sm:$0xff] %v1408_v60   ;;  %v752_v8 = vadd.f32 %v1882_v42, %v681_v62  ;;  %v682_v10 = vmul.f32 %v1636_v6, %v1877_v40  ;;  %v468_v12 = vpop.f32.mrb[19].mxu0  ;;  %v596_v13 = vpop.f32.mrb[19].mxu1 }
 0x13e   :  { %1552 = vst [vmem:[#allocation7 + $0xb8] sm:$0xff] %v1488_v61   ;;  %v784_v9 = vadd.f32 %v1882_v42, %v713_v63  ;;  %v714_v11 = vmul.f32 %v1668_v7, %v1877_v40  ;;  %v750_v14 = vadd.f32 %v1882_v42, %v679_v4  ;;  %v782_v15 = vadd.f32 %v1882_v42, %v711_v5 }
 0x13f   :  { %1535 = vst [vmem:[#allocation7 + $0x30] sm:$0xff] %v1403_v2   ;;  %1551 = vst [vmem:[#allocation7 + $0xb0] sm:$0xff] %v1483_v3   ;;  %v680_v16 = vmul.f32 %v1877_v40, %v468_v12  ;;  %v712_v17 = vmul.f32 %v1877_v40, %v596_v13  ;;  %v753_v18 = vadd.f32 %v1882_v42, %v682_v10  ;;  %v816_v22 = vmax.f32 %v752_v8, 0.0 }
 0x140   :  { %v785_v19 = vadd.f32 %v1882_v42, %v714_v11  ;;  %v848_v23 = vmax.f32 %v784_v9, 0.0  ;;  %v814_v26 = vmax.f32 %v750_v14, 0.0  ;;  %v846_v27 = vmax.f32 %v782_v15, 0.0 }
 0x141   :  { %v751_v20 = vadd.f32 %v1882_v42, %v680_v16  ;;  %v783_v21 = vadd.f32 %v1882_v42, %v712_v17  ;;  %v817_v24 = vmax.f32 %v753_v18, 0.0 }
 0x142   :  { %v849_v25 = vmax.f32 %v785_v19, 0.0  ;;  %v1639_v30 = vpop.f32.mrb[20].mxu0  ;;  %v1671_v31 = vpop.f32.mrb[20].mxu1 }
 0x143   :  { %v815_v28 = vmax.f32 %v751_v20, 0.0  ;;  %v847_v29 = vmax.f32 %v783_v21, 0.0  ;;  %v1418_v32 = vpack.c.bf16 %v817_v24, %v816_v22  ;;  %v685_v34 = vmul.f32 %v1639_v30, %v1877_v40  ;;  %v481_v36 = vpop.f32.mrb[21].mxu0  ;;  %v609_v37 = vpop.f32.mrb[21].mxu1 }
 0x144   :  { %v1498_v33 = vpack.c.bf16 %v849_v25, %v848_v23  ;;  %v717_v35 = vmul.f32 %v1671_v31, %v1877_v40  ;;  %v683_v41 = vmul.f32 %v1877_v40, %v481_v36  ;;  %v715_v43 = vmul.f32 %v1877_v40, %v609_v37  ;;  %v1640_v44 = vpop.f32.mrb[22].mxu0  ;;  %v1672_v45 = vpop.f32.mrb[22].mxu1 }
 0x145   :  { %v1413_v38 = vpack.c.bf16 %v815_v28, %v814_v26  ;;  %v1493_v39 = vpack.c.bf16 %v847_v29, %v846_v27  ;;  %1538 = vst [vmem:[#allocation7 + $0x48] sm:$0xff] %v1418_v32   ;;  %v756_v46 = vadd.f32 %v1882_v42, %v685_v34  ;;  %v686_v48 = vmul.f32 %v1640_v44, %v1877_v40  ;;  %v484_v50 = vpop.f32.mrb[23].mxu0  ;;  %v612_v51 = vpop.f32.mrb[23].mxu1 }
 0x146   :  { %1554 = vst [vmem:[#allocation7 + $0xc8] sm:$0xff] %v1498_v33   ;;  %v788_v47 = vadd.f32 %v1882_v42, %v717_v35  ;;  %v718_v49 = vmul.f32 %v1672_v45, %v1877_v40  ;;  %v754_v52 = vadd.f32 %v1882_v42, %v683_v41  ;;  %v786_v53 = vadd.f32 %v1882_v42, %v715_v43 }
 0x147   :  { %1537 = vst [vmem:[#allocation7 + $0x40] sm:$0xff] %v1413_v38   ;;  %1553 = vst [vmem:[#allocation7 + $0xc0] sm:$0xff] %v1493_v39   ;;  %v684_v54 = vmul.f32 %v1877_v40, %v484_v50  ;;  %v716_v55 = vmul.f32 %v1877_v40, %v612_v51  ;;  %v757_v56 = vadd.f32 %v1882_v42, %v686_v48  ;;  %v820_v60 = vmax.f32 %v756_v46, 0.0 }
 0x148   :  { %v789_v57 = vadd.f32 %v1882_v42, %v718_v49  ;;  %v852_v61 = vmax.f32 %v788_v47, 0.0  ;;  %v818_v0 = vmax.f32 %v754_v52, 0.0  ;;  %v850_v1 = vmax.f32 %v786_v53, 0.0 }
 0x149   :  { %v755_v58 = vadd.f32 %v1882_v42, %v684_v54  ;;  %v787_v59 = vadd.f32 %v1882_v42, %v716_v55  ;;  %v821_v62 = vmax.f32 %v757_v56, 0.0 }
 0x14a   :  { %v853_v63 = vmax.f32 %v789_v57, 0.0  ;;  %v1643_v4 = vpop.f32.mrb[24].mxu0  ;;  %v1675_v5 = vpop.f32.mrb[24].mxu1 }
 0x14b   :  { %v819_v2 = vmax.f32 %v755_v58, 0.0  ;;  %v851_v3 = vmax.f32 %v787_v59, 0.0  ;;  %v1428_v6 = vpack.c.bf16 %v821_v62, %v820_v60  ;;  %v689_v8 = vmul.f32 %v1643_v4, %v1877_v40  ;;  %v497_v10 = vpop.f32.mrb[25].mxu0  ;;  %v625_v11 = vpop.f32.mrb[25].mxu1 }
 0x14c   :  { %v1508_v7 = vpack.c.bf16 %v853_v63, %v852_v61  ;;  %v721_v9 = vmul.f32 %v1675_v5, %v1877_v40  ;;  %v687_v14 = vmul.f32 %v1877_v40, %v497_v10  ;;  %v719_v15 = vmul.f32 %v1877_v40, %v625_v11  ;;  %v1644_v16 = vpop.f32.mrb[26].mxu0  ;;  %v1676_v17 = vpop.f32.mrb[26].mxu1 }
 0x14d   :  { %v1423_v12 = vpack.c.bf16 %v819_v2, %v818_v0  ;;  %v1503_v13 = vpack.c.bf16 %v851_v3, %v850_v1  ;;  %1540 = vst [vmem:[#allocation7 + $0x58] sm:$0xff] %v1428_v6   ;;  %v760_v18 = vadd.f32 %v1882_v42, %v689_v8  ;;  %v690_v20 = vmul.f32 %v1644_v16, %v1877_v40  ;;  %v500_v22 = vpop.f32.mrb[27].mxu0  ;;  %v628_v23 = vpop.f32.mrb[27].mxu1 }
 0x14e   :  { %1556 = vst [vmem:[#allocation7 + $0xd8] sm:$0xff] %v1508_v7   ;;  %v792_v19 = vadd.f32 %v1882_v42, %v721_v9  ;;  %v722_v21 = vmul.f32 %v1676_v17, %v1877_v40  ;;  %v758_v24 = vadd.f32 %v1882_v42, %v687_v14  ;;  %v790_v25 = vadd.f32 %v1882_v42, %v719_v15 }
 0x14f   :  { %1539 = vst [vmem:[#allocation7 + $0x50] sm:$0xff] %v1423_v12   ;;  %1555 = vst [vmem:[#allocation7 + $0xd0] sm:$0xff] %v1503_v13   ;;  %v688_v26 = vmul.f32 %v1877_v40, %v500_v22  ;;  %v720_v27 = vmul.f32 %v1877_v40, %v628_v23  ;;  %v761_v28 = vadd.f32 %v1882_v42, %v690_v20  ;;  %v824_v32 = vmax.f32 %v760_v18, 0.0 }
 0x150   :  { %v793_v29 = vadd.f32 %v1882_v42, %v722_v21  ;;  %v856_v33 = vmax.f32 %v792_v19, 0.0  ;;  %v822_v36 = vmax.f32 %v758_v24, 0.0  ;;  %v854_v37 = vmax.f32 %v790_v25, 0.0 }
 0x151   :  { %v759_v30 = vadd.f32 %v1882_v42, %v688_v26  ;;  %v791_v31 = vadd.f32 %v1882_v42, %v720_v27  ;;  %v825_v34 = vmax.f32 %v761_v28, 0.0 }
 0x152   :  { %v857_v35 = vmax.f32 %v793_v29, 0.0  ;;  %v1647_v41 = vpop.f32.mrb[28].mxu0  ;;  %v1679_v43 = vpop.f32.mrb[28].mxu1 }
 0x153   :  { %v823_v38 = vmax.f32 %v759_v30, 0.0  ;;  %v855_v39 = vmax.f32 %v791_v31, 0.0  ;;  %v1438_v44 = vpack.c.bf16 %v825_v34, %v824_v32  ;;  %v693_v46 = vmul.f32 %v1647_v41, %v1877_v40  ;;  %v513_v48 = vpop.f32.mrb[29].mxu0  ;;  %v641_v49 = vpop.f32.mrb[29].mxu1 }
 0x154   :  { %v1518_v45 = vpack.c.bf16 %v857_v35, %v856_v33  ;;  %v725_v47 = vmul.f32 %v1679_v43, %v1877_v40  ;;  %v691_v52 = vmul.f32 %v1877_v40, %v513_v48  ;;  %v723_v53 = vmul.f32 %v1877_v40, %v641_v49  ;;  %v1648_v54 = vpop.f32.mrb[30].mxu0  ;;  %v1680_v55 = vpop.f32.mrb[30].mxu1 }
 0x155   :  { %v1433_v50 = vpack.c.bf16 %v823_v38, %v822_v36  ;;  %v1513_v51 = vpack.c.bf16 %v855_v39, %v854_v37  ;;  %1542 = vst [vmem:[#allocation7 + $0x68] sm:$0xff] %v1438_v44   ;;  %v764_v56 = vadd.f32 %v1882_v42, %v693_v46  ;;  %v694_v58 = vmul.f32 %v1648_v54, %v1877_v40  ;;  %v516_v60 = vpop.f32.mrb[31].mxu0  ;;  %v644_v61 = vpop.f32.mrb[31].mxu1 }
 0x156   :  { %1558 = vst [vmem:[#allocation7 + $0xe8] sm:$0xff] %v1518_v45   ;;  %v796_v57 = vadd.f32 %v1882_v42, %v725_v47  ;;  %v726_v59 = vmul.f32 %v1680_v55, %v1877_v40  ;;  %v762_v62 = vadd.f32 %v1882_v42, %v691_v52  ;;  %v794_v63 = vadd.f32 %v1882_v42, %v723_v53 }
 0x157   :  { %1541 = vst [vmem:[#allocation7 + $0x60] sm:$0xff] %v1433_v50   ;;  %1557 = vst [vmem:[#allocation7 + $0xe0] sm:$0xff] %v1513_v51   ;;  %v692_v0 = vmul.f32 %v1877_v40, %v516_v60  ;;  %v724_v1 = vmul.f32 %v1877_v40, %v644_v61  ;;  %v765_v2 = vadd.f32 %v1882_v42, %v694_v58  ;;  %v828_v6 = vmax.f32 %v764_v56, 0.0 }
 0x158   :  { %v797_v3 = vadd.f32 %v1882_v42, %v726_v59  ;;  %v860_v7 = vmax.f32 %v796_v57, 0.0  ;;  %v826_v10 = vmax.f32 %v762_v62, 0.0  ;;  %v858_v11 = vmax.f32 %v794_v63, 0.0 }
 0x159   :  { %v763_v4 = vadd.f32 %v1882_v42, %v692_v0  ;;  %v795_v5 = vadd.f32 %v1882_v42, %v724_v1  ;;  %v829_v8 = vmax.f32 %v765_v2, 0.0 }
 0x15a   :  { %v861_v9 = vmax.f32 %v797_v3, 0.0 }
 0x15b   :  { %v827_v12 = vmax.f32 %v763_v4, 0.0  ;;  %v859_v13 = vmax.f32 %v795_v5, 0.0  ;;  %v1448_v14 = vpack.c.bf16 %v829_v8, %v828_v6 }
 0x15c   :  { %v1528_v40 = vpack.c.bf16 %v861_v9, %v860_v7 }
 0x15d   :  { %v1443_v15 = vpack.c.bf16 %v827_v12, %v826_v10  ;;  %v1523_v16 = vpack.c.bf16 %v859_v13, %v858_v11  ;;  %1544 = vst [vmem:[#allocation7 + $0x78] sm:$0xff] %v1448_v14  }
 0x15e   :  { %1560 = vst [vmem:[#allocation7 + $0xf8] sm:$0xff] %v1528_v40  }
 0x15f   :  { %1543 = vst [vmem:[#allocation7 + $0x70] sm:$0xff] %v1443_v15   ;;  %1559 = vst [vmem:[#allocation7 + $0xf0] sm:$0xff] %v1523_v16  }
 0x160   :  { %1797 = shalt.err (!%p1794_p6)
}
 0x161   :  { %s1798_s20 = scalar_lea.hbm %s2031_s4, 4096 }
 0x162   :  { %p1799_p7 = scmp.ne.s32.totalorder %s2031_s4, %s1798_s20  ;;  %p1802_p8 = scmp.lt.u32.totalorder %s1798_s20, %s2031_s4 }
 0x164   :  { %p1804_p9 = pnand %p1802_p8, %p1799_p7 }
 0x166   :  { %1807 = shalt.err (!%p1804_p9)
}
 0x167   :  { %1193 = dma.vmem_to_hbm [thread:$0]  %s1188_s3, 4096, %s2031_s4, [#allocation4], %s1815_s25, %s1815_s25, %s1816_s26  }
 0x168   :  { %1812 = dma.done.wait [#allocation4], 4096  }
 0x169   :  { %1813 = vsyncadd [#allocation4], 4294963200 }
 0x16a   :  { %1197 = vsyncpa [#allocation3], 1 }
 0x16b   :  { %1198 = vsyncpa [#allocation6], 1 }
 0x16c   :  { %1199 = vsyncpa [#allocation4], 1 }

</bundles_post_ra>
